<compile_context>
chip_gen: v7x
topology: tpu7x:2x2x1
jax: 0.10.0
libtpu: 0.0.40
codegen_flags: <defaults>
</compile_context>

<pallas_src>
import jax
import jax.numpy as jnp
from jax.experimental import pallas as pl
from jax.experimental.pallas import tpu as pltpu

_LANES = 512              # lane-dense last dim (multiple of 128)
_TILE_ROWS = 512          # rows per tile (multiple of 8); ~1 MiB f32 tiles
_PALLAS_MIN_ELEMS = 512   # below this, let XLA fuse the op (overhead-dominated)


def _partial_sum_kernel(x_ref, sum_ref):
    """Accumulate the global f32 sum across the sequential tile axis."""
    @pl.when(pl.program_id(0) == 0)
    def _():
        sum_ref[...] = jnp.zeros_like(sum_ref)

    sum_ref[...] += jnp.sum(x_ref[...].astype(jnp.float32))


def _subtract_kernel(mean_ref, x_ref, o_ref):
    """o = x - mean, mean is a scalar living in SMEM."""
    mean = mean_ref[0]  # f32 scalar
    o_ref[...] = (x_ref[...].astype(jnp.float32) - mean).astype(o_ref.dtype)


def centered_layer(x):
    """CenteredLayer.forward: X - X.mean() (global scalar mean, broadcast subtract)."""
    orig_shape = x.shape
    orig_dtype = x.dtype
    n = x.size

    # Tiny inputs: custom-call + grid-step overhead dwarfs 2 flops/element.
    if n < _PALLAS_MIN_ELEMS:
        return x - jnp.mean(x)

    # Flatten fully and re-slab lane-dense: (rows, _LANES). Mean is global, so
    # layout is free; zero-pad up to whole (tile_rows, _LANES) tiles.
    flat = x.reshape(-1)
    rows = -(-n // _LANES)
    if rows >= _TILE_ROWS:
        tile_rows = _TILE_ROWS
    else:
        tile_rows = -(-rows // 8) * 8          # keep (8, 128) tiling constraint
    rows_padded = -(-rows // tile_rows) * tile_rows
    padded_n = rows_padded * _LANES
    if padded_n != n:
        flat = jnp.pad(flat, (0, padded_n - n))  # zeros: neutral for the sum
    x2 = flat.reshape(rows_padded, _LANES)
    num_tiles = rows_padded // tile_rows

    # ---- Pass 1: streamed partial sums -> global f32 sum (resident accumulator).
    total = pl.pallas_call(
        _partial_sum_kernel,
        out_shape=jax.ShapeDtypeStruct((1, 1), jnp.float32),
        grid=(num_tiles,),
        in_specs=[pl.BlockSpec((tile_rows, _LANES), lambda i: (i, 0))],
        out_specs=pl.BlockSpec((1, 1), lambda i: (0, 0)),
        compiler_params=pltpu.CompilerParams(
            dimension_semantics=("arbitrary",)),
    )(x2)

    # Divide by the TRUE element count (padding excluded), keep f32 numerics.
    mean = (total / jnp.float32(n)).reshape(1)

    # ---- Pass 2: broadcast subtract; mean delivered as an SMEM scalar.
    out2 = pl.pallas_call(
        _subtract_kernel,
        out_shape=jax.ShapeDtypeStruct(x2.shape, orig_dtype),
        grid=(num_tiles,),
        in_specs=[
            pl.BlockSpec(memory_space=pltpu.MemorySpace.SMEM),          # mean (1,)
            pl.BlockSpec((tile_rows, _LANES), lambda i: (i, 0)),        # x tiles
        ],
        out_specs=pl.BlockSpec((tile_rows, _LANES), lambda i: (i, 0)),
        compiler_params=pltpu.CompilerParams(
            dimension_semantics=("parallel",)),                         # v7x 2 TCs
    )(mean, x2)

    # Strip padding and restore the original shape.
    return out2.reshape(-1)[:n].reshape(orig_shape)


if __name__ == "__main__":
    key = jax.random.PRNGKey(0)

    # Small shape consistent with the module's elementwise semantics; large
    # enough to exercise the tiled Pallas path.
    x = jax.random.uniform(key, (2, 4, 16, 16), dtype=jnp.float32)
    y = centered_layer(x)
    jax.block_until_ready(y)

    y_ref = x - jnp.mean(x)
    assert y.shape == x.shape and y.dtype == x.dtype
    assert jnp.allclose(y, y_ref, atol=1e-5), "mismatch vs reference (Pallas path)"
    assert abs(float(jnp.mean(y))) < 1e-5

    # The original module's toy input X = rand(2, 4): tiny-input fast path.
    x_small = jax.random.uniform(jax.random.PRNGKey(0), (2, 4), dtype=jnp.float32)
    y_small = centered_layer(x_small)
    jax.block_until_ready(y_small)
    assert jnp.allclose(y_small, x_small - jnp.mean(x_small), atol=1e-6), \
        "mismatch vs reference (small path)"

    print("KERNEL_OK")
</pallas_src>

<mosaic_0001>
module attributes {stable_mosaic.version = 11 : i64} {
  func.func @_partial_sum_kernel(%arg0: i32, %arg1: memref<8x512xf32, #tpu.memory_space<vmem>>, %arg2: memref<1x1xf32, #tpu.memory_space<vmem>>) attributes {dimension_semantics = [#tpu.dimension_semantics<arbitrary>], iteration_bounds = array<i64: 1>, scalar_prefetch = 0 : i64, scratch_operands = 0 : i64, tpu.core_type = #tpu.core_type<tc>, window_params = [{transform_indices = @transform_0, window_bounds = array<i64: 8, 512>}, {pipeline_mode = #tpu.pipeline_mode<synchronous>, transform_indices = @transform_1, window_bounds = array<i64: 1, 1>}]} {
    %c0_i32 = arith.constant 0 : i32
    %0 = arith.cmpi eq, %arg0, %c0_i32 : i32
    %1 = arith.extui %0 : i1 to i32
    %c0_i32_0 = arith.constant 0 : i32
    %2 = arith.cmpi ne, %1, %c0_i32_0 : i32
    scf.if %2 {
      %cst_6 = arith.constant 0.000000e+00 : f32
      %12 = vector.broadcast %cst_6 : f32 to vector<1x1xf32>
      %c0_7 = arith.constant 0 : index
      %c0_8 = arith.constant 0 : index
      %13 = vector.load %arg2[%c0_7, %c0_8] : memref<1x1xf32, #tpu.memory_space<vmem>>, vector<1x1xf32>
      tpu.vector_store %arg2[%c0_7, %c0_8], %12 {strides = array<i32>} : memref<1x1xf32, #tpu.memory_space<vmem>>, vector<1x1xf32>,
    } else {
    }
    %c0 = arith.constant 0 : index
    %c0_1 = arith.constant 0 : index
    %3 = vector.load %arg2[%c0, %c0_1] : memref<1x1xf32, #tpu.memory_space<vmem>>, vector<1x1xf32>
    %c0_2 = arith.constant 0 : index
    %c0_3 = arith.constant 0 : index
    %4 = vector.load %arg1[%c0_2, %c0_3] : memref<8x512xf32, #tpu.memory_space<vmem>>, vector<8x512xf32>
    %5 = vector.shape_cast %4 : vector<8x512xf32> to vector<1x8x512xf32>
    %cst = arith.constant dense<0.000000e+00> : vector<1xf32>
    %6 = vector.multi_reduction <add>, %5, %cst [1, 2] : vector<1x8x512xf32> to vector<1xf32>
    %7 = vector.shape_cast %6 : vector<1xf32> to vector<1x1x1xf32>
    %8 = vector.extract %7[0, 0, 0] : f32 from vector<1x1x1xf32>
    %9 = vector.broadcast %8 : f32 to vector<1x1xf32>
    %10 = arith.addf %3, %9 : vector<1x1xf32>
    %c0_4 = arith.constant 0 : index
    %c0_5 = arith.constant 0 : index
    %11 = vector.load %arg2[%c0_4, %c0_5] : memref<1x1xf32, #tpu.memory_space<vmem>>, vector<1x1xf32>
    tpu.vector_store %arg2[%c0_4, %c0_5], %10 {strides = array<i32>} : memref<1x1xf32, #tpu.memory_space<vmem>>, vector<1x1xf32>,
    return
  }
  func.func @transform_0(%arg0: i32) -> (i32, i32) {
    %c0_i32 = arith.constant 0 : i32
    %c0_i32_0 = arith.constant 0 : i32
    return %arg0, %c0_i32 : i32, i32
  }
  func.func @transform_1(%arg0: i32) -> (i32, i32) {
    %c0_i32 = arith.constant 0 : i32
    %c0_i32_0 = arith.constant 0 : i32
    %c0_i32_1 = arith.constant 0 : i32
    return %c0_i32, %c0_i32_0 : i32, i32
  }
}

</mosaic_0001>

<bundles_post_ra>
// kernel: tpu_custom_call.1
= control target key start
LH: loop header
LB: loop body
LE: loop exit
PB: predicated region body
PF: predicated region fallthrough
CT: control target
= control target key end

     0   :  { %6 = vsyncpa [#allocation3], 0  ;;  %s155_s0 = inlined_call_operand.hbm [shape: f32[8,512], index: 0, kind: input, shape index: {}]   ;;  %s156_s1 = inlined_call_operand.hbm [shape: f32[1,1], index: 1, kind: output, shape index: {}]  }
   0x1   :  { %7 = vsyncpa [#allocation4], 0  ;;  %s116_s6 = smov [#allocation2]   ;;  %s68_s10 = scalar_lea.hbm %s155_s0, 512 }
   0x2   :  { %s14_s7 = sshll.u32 %s116_s6, 4  ;;  %p69_p0 = scmp.ne.s32.totalorder %s155_s0, %s68_s10  ;;  %s15_s7 = int_to_ptr.vmem [resolvable:$true] %s14_s7 }
   0x3   :  { %p72_p1 = scmp.lt.u32.totalorder %s68_s10, %s155_s0 }
   0x5   :  { %p74_p2 = pnand %p72_p1, %p69_p0 }
   0x7   :  { %77 = shalt.err (!%p74_p2)
}
   0x8   :  { %s78_s15 = scalar_lea.vmem %s15_s7, 512  ;;  %p83_p4 = scmp.lt.s32.totalorder %s15_s7, %s15_s7 }
   0x9   :  { %p79_p3 = scmp.ne.s32.totalorder %s15_s7, %s78_s15  ;;  %p84_p5 = scmp.lt.s32.totalorder %s78_s15, %s78_s15 }
   0xb   :  { %p85_p6 = por %p84_p5, %p83_p4 }
   0xd   :  { %p86_p7 = pnand %p85_p6, %p79_p3 }
   0xf   :  { %89 = shalt.err (!%p86_p7)
}
  0x10   :  { %17 = dma.hbm_to_vmem [thread:$0]  %s155_s0, 512, %s15_s7, [#allocation3]  }
  0x11   :  { %112 = dma.done.wait [#allocation3], 512  }
  0x12   :  { %113 = vsyncadd [#allocation3], 4294966784  ;;  %vm25_vm0 = vcmask 0   ;;  %v117_v0 = vmov 0.0   ;;  %v28_v1 = vld [vmem:[#allocation2] sm:$0xff]  ;;  %v29_v2 = vld [vmem:[#allocation2 + $0x8] sm:$0xff] }
  0x13   :  { %26 = vst.msk [vmem:[#allocation5] sm:$0x1] %vm25_vm0, %v117_v0  ;;  %v30_v3 = vld [vmem:[#allocation2 + $0x10] sm:$0xff]  ;;  %v32_v4 = vadd.f32 %v29_v2, %v28_v1  ;;  %v31_v5 = vld [vmem:[#allocation2 + $0x18] sm:$0xff]  ;;  %s118_s0 = smov [#allocation5]  }
  0x14   :  { %s54_s18 = sshll.u32 %s118_s0, 4  ;;  %s55_s18 = int_to_ptr.vmem [resolvable:$true] %s54_s18 }
  0x15   :  { %v33_v6 = vadd.f32 %v32_v4, %v30_v3  ;;  %s90_s20 = scalar_lea.vmem %s55_s18, 16  ;;  %s94_s21 = scalar_lea.vmem %s55_s18, 32 }
  0x16   :  { %p91_p8 = scmp.ne.s32.totalorder %s55_s18, %s90_s20  ;;  %p95_p9 = scmp.lt.s32.totalorder %s55_s18, %s55_s18 }
  0x17   :  { %v34_v7 = vadd.f32 %v33_v6, %v31_v5  ;;  %p96_p10 = scmp.lt.s32.totalorder %s94_s21, %s90_s20 }
  0x19   :  { %35 = vadd.xlane.f32.xlu0 %v34_v7  ;;  %p97_p11 = por %p96_p10, %p95_p9 }
  0x1a   :  { %v27_v15 = vld [vmem:[#allocation5] sm:$0x1] }
  0x1b   :  { %p98_p12 = pnand %p97_p11, %p91_p8 }
  0xa6   :  { %v36_v8 = vpop.xlane.xlu0 %35 }
  0xa7   :  { %v37_v9 = vrot.slane %v36_v8, 4 }
  0xa9   :  { %v38_v10 = vadd.f32 %v37_v9, %v36_v8 }
  0xab   :  { %v39_v11 = vrot.slane %v38_v10, 2 }
  0xad   :  { %v40_v12 = vadd.f32 %v39_v11, %v38_v10 }
  0xaf   :  { %v41_v13 = vrot.slane %v40_v12, 1 }
  0xb1   :  { %v42_v14 = vadd.f32 %v41_v13, %v40_v12 }
  0xb3   :  { %63 = vpush %v42_v14 }
  0xe4   :  { %s64_s19 = spop %63 }
  0xe5   :  { %v44_v16 = vstv %s64_s19 }
  0xe6   :  { %v45_v17 = vadd.f32 %v44_v16, %v27_v15 }
  0xe8   :  { %47 = vst.msk [vmem:[#allocation5] sm:$0x1] %vm25_vm0, %v45_v17 }
  0xe9   :  { %101 = shalt.err (!%p98_p12)
}
  0xea   :  { %s102_s24 = scalar_lea.hbm %s156_s1, 16 }
  0xeb   :  { %p103_p13 = scmp.ne.s32.totalorder %s156_s1, %s102_s24  ;;  %p106_p0 = scmp.lt.u32.totalorder %s102_s24, %s156_s1 }
  0xed   :  { %p108_p1 = pnand %p106_p0, %p103_p13 }
  0xef   :  { %111 = shalt.err (!%p108_p1)
}
  0xf0   :  { %57 = dma.vmem_to_hbm [thread:$0]  %s55_s18, 16, %s156_s1, [#allocation4]  }
  0xf1   :  { %114 = dma.done.wait [#allocation4], 16  }
  0xf2   :  { %115 = vsyncadd [#allocation4], 4294967280 }
  0xf3   :  { %61 = vsyncpa [#allocation3], 1 }
  0xf4   :  { %62 = vsyncpa [#allocation4], 1 }

</bundles_post_ra>
